<compile_context>
chip_gen: v7x
topology: tpu7x:2x2x1
jax: 0.10.0
libtpu: 0.0.40
codegen_flags: <defaults>
</compile_context>

<pallas_src>
import numpy as np
import jax
import jax.numpy as jnp
from jax import lax
from jax.experimental import pallas as pl
from jax.experimental.pallas import tpu as pltpu


_TM = 8        # spans per grid step (one full sublane group in the output block)
_C_PAD = 128   # classifier logits padded to a full lane width (sliced back to 5 on host)


def _round_up(x, m):
    return -(-x // m) * m


# -----------------------------------------------------------------------------
# Kernel A: hoisted unary_affine — per-token score for the whole packed context
# -----------------------------------------------------------------------------
def _token_score_kernel(emb_ref, wu_ref, bu_ref, out_ref):
    out_ref[...] = (
        jnp.dot(emb_ref[...], wu_ref[...], preferred_element_type=jnp.float32)
        + bu_ref[...]
    )


def token_scores(packed_emb, wu_col, bu):
    NL_ctx, _ = packed_emb.shape
    return pl.pallas_call(
        _token_score_kernel,
        out_shape=jax.ShapeDtypeStruct((NL_ctx, 1), jnp.float32),
        in_specs=[pl.BlockSpec(memory_space=pltpu.MemorySpace.VMEM)] * 3,
        out_specs=pl.BlockSpec(memory_space=pltpu.MemorySpace.VMEM),
    )(packed_emb, wu_col, bu)


# -----------------------------------------------------------------------------
# Kernel B: block-of-spans gather + masked softmax + attention pool + fused head
# -----------------------------------------------------------------------------
def _span_block_kernel(starts_ref,                        # SMEM prefetch: [NM_pad] i32
                       emb_ref, tscore_ref, addmask_ref,  # VMEM: [NL_ctx,D], [NL_ctx,1], [TM*JR,1]
                       wd_ref, bd_ref, wc_ref, bc_ref,    # VMEM: [D,D], [1,D], [D,128], [1,128]
                       out_ref,                           # VMEM out block: [TM, 128]
                       g_ref, s_ref):                     # VMEM scratch: [TM*JR,D], [TM*JR,1]
    i = pl.program_id(0)
    TMJR, _ = g_ref.shape
    TM = out_ref.shape[0]
    JR = TMJR // TM

    # Gather: one contiguous JR-row slice per span (+ its hoisted token scores).
    # Static unroll over the TM spans of this block; the copies are independent chains.
    for t in range(TM):
        start = starts_ref[i * TM + t]
        g_ref[pl.ds(t * JR, JR), :] = emb_ref[pl.ds(start, JR), :]
        s_ref[pl.ds(t * JR, JR), :] = tscore_ref[pl.ds(start, JR), :]

    span_emb = g_ref[...]                                 # [TM*JR, D]
    score = s_ref[...] + addmask_ref[...]                 # [TM*JR, 1]  (masked rows ~ -10000)

    # Softmax per span (segments of JR rows).  Subtracting the block-wide max is exact for
    # softmax (a per-span constant shift); per-span normalisation happens via the selector matmul.
    m = jnp.max(score, axis=0, keepdims=True)             # [1, 1]
    e = jnp.exp(score - m)                                # [TM*JR, 1]; masked rows underflow to 0

    # Block-diagonal selector sel[t, r] = 1 iff row r belongs to span t  -> segment sums on MXU.
    row = lax.broadcasted_iota(jnp.int32, (TM, TMJR), 1)
    seg = lax.broadcasted_iota(jnp.int32, (TM, TMJR), 0)
    lo = seg * JR
    sel = ((row >= lo) & (row < lo + JR)).astype(jnp.float32)

    pooled_un = jnp.dot(sel, e * span_emb, preferred_element_type=jnp.float32)   # [TM, D]
    denom = jnp.dot(sel, e, preferred_element_type=jnp.float32)                  # [TM, 1]
    pooled = pooled_un / denom                             # lane-broadcast divide

    # Fused head: dense + tanh + classifier (dropout is identity at inference).
    h = jnp.tanh(jnp.dot(pooled, wd_ref[...], preferred_element_type=jnp.float32) + bd_ref[...])
    out_ref[...] = jnp.dot(h, wc_ref[...], preferred_element_type=jnp.float32) + bc_ref[...]


def span_pool_classify(starts_pad, packed_emb, tok_scores, addmask,
                       wd_t, bd, wc_pad, bc_pad, *, tm, jr):
    NL_ctx, D = packed_emb.shape
    NM_pad = starts_pad.shape[0]
    c_pad = wc_pad.shape[1]

    return pl.pallas_call(
        _span_block_kernel,
        out_shape=jax.ShapeDtypeStruct((NM_pad, c_pad), jnp.float32),
        grid_spec=pltpu.PrefetchScalarGridSpec(
            num_scalar_prefetch=1,
            grid=(NM_pad // tm,),
            in_specs=[
                pl.BlockSpec((NL_ctx, D), lambda i, st: (0, 0)),    # packed context (resident)
                pl.BlockSpec((NL_ctx, 1), lambda i, st: (0, 0)),    # hoisted token scores
                pl.BlockSpec((tm * jr, 1), lambda i, st: (i, 0)),   # additive span mask block
                pl.BlockSpec((D, D), lambda i, st: (0, 0)),         # dense weight (transposed)
                pl.BlockSpec((1, D), lambda i, st: (0, 0)),         # dense bias
                pl.BlockSpec((D, c_pad), lambda i, st: (0, 0)),     # classifier weight (padded)
                pl.BlockSpec((1, c_pad), lambda i, st: (0, 0)),     # classifier bias (padded)
            ],
            out_specs=pl.BlockSpec((tm, c_pad), lambda i, st: (i, 0)),
            scratch_shapes=[
                pltpu.VMEM((tm * jr, D), jnp.float32),
                pltpu.VMEM((tm * jr, 1), jnp.float32),
            ],
        ),
        compiler_params=pltpu.CompilerParams(dimension_semantics=("parallel",)),
    )(starts_pad, packed_emb, tok_scores, addmask, wd_t, bd, wc_pad, bc_pad)


# -----------------------------------------------------------------------------
# Wrapper: mirrors mode == 'classify_inference' of the PyTorch module
# -----------------------------------------------------------------------------
def classify_inference(params, attention_mask, span_starts, span_ends, sequence_input, *, tm=_TM):
    am = np.asarray(attention_mask, np.int32)
    ss = np.asarray(span_starts, np.int32)
    se = np.asarray(span_ends, np.int32)
    N, L = am.shape
    M = ss.shape[1]
    NM = N * M
    D = sequence_input.shape[-1]

    # ---- integer bookkeeping of get_span_representation (host-side numpy, like the torch code) ----
    input_len = am.sum(-1).astype(np.int32)
    word_offset = (np.cumsum(input_len) - input_len).astype(np.int32)
    starts_off = (ss + word_offset[:, None]).reshape(-1).astype(np.int32)
    ends_off = (se + word_offset[:, None]).reshape(-1).astype(np.int32)
    width = (ends_off - starts_off + 1).astype(np.int32)

    JR = _round_up(max(int(width.max()), 1), 8)          # span window, padded to sublane multiple
    NM_pad = _round_up(NM, tm)                           # spans padded to a whole block
    text_len = int(am.sum())
    NL_ctx = _round_up(text_len + JR, 8)                 # room for slices running past the end

    starts_pad = np.zeros((NM_pad,), np.int32)
    starts_pad[:NM] = starts_off
    width_pad = np.ones((NM_pad,), np.int32)
    width_pad[:NM] = width

    jpos = np.arange(JR, dtype=np.int32)[None, :]
    addmask = np.where(jpos < width_pad[:, None], 0.0, -10000.0).astype(np.float32)
    addmask = addmask.reshape(NM_pad * JR, 1)

    valid_rows = np.nonzero(am.reshape(-1))[0].astype(np.int32)

    # ---- pack the context (flatten_emb_by_sentence) and pad with JR zero rows ----
    flat = sequence_input.reshape(N * L, D).astype(jnp.float32)
    packed = jnp.take(flat, jnp.asarray(valid_rows), axis=0)
    packed = jnp.concatenate(
        [packed, jnp.zeros((NL_ctx - text_len, D), jnp.float32)], axis=0)

    C = params["wc"].shape[0]
    wc_pad = jnp.zeros((D, _C_PAD), jnp.float32).at[:, :C].set(params["wc"].T)
    bc_pad = jnp.zeros((1, _C_PAD), jnp.float32).at[:, :C].set(params["bc"])

    tok = token_scores(packed, params["wu"].T.astype(jnp.float32), params["bu"])

    logits_pad = span_pool_classify(
        jnp.asarray(starts_pad), packed, tok, jnp.asarray(addmask),
        params["wd"].T, params["bd"], wc_pad, bc_pad, tm=tm, jr=JR)

    return logits_pad[:NM, :C].reshape(N, M, C)          # reconstruct(ac_logits, span_starts)


# -----------------------------------------------------------------------------
# Pure-JAX reference with identical semantics (for verification)
# -----------------------------------------------------------------------------
def classify_inference_ref(params, attention_mask, span_starts, span_ends, sequence_input):
    am = np.asarray(attention_mask, np.int32)
    ss = np.asarray(span_starts, np.int32)
    se = np.asarray(span_ends, np.int32)
    N, L = am.shape
    M = ss.shape[1]
    D = sequence_input.shape[-1]

    input_len = am.sum(-1).astype(np.int32)
    word_offset = (np.cumsum(input_len) - input_len).astype(np.int32)
    starts_off = (ss + word_offset[:, None]).reshape(-1)
    ends_off = (se + word_offset[:, None]).reshape(-1)
    width = ends_off - starts_off + 1
    JR = int(width.max())
    text_len = int(am.sum())
    valid = np.nonzero(am.reshape(-1))[0]
    idx = np.minimum(np.arange(JR)[None, :] + starts_off[:, None], text_len - 1)

    flat = sequence_input.reshape(N * L, D)
    packed = jnp.take(flat, jnp.asarray(valid), axis=0)
    span_emb = jnp.take(packed, jnp.asarray(idx), axis=0)                     # [NM, JR, D]
    maskf = jnp.asarray((np.arange(JR)[None, :] < width[:, None]).astype(np.float32))
    score = jnp.einsum("njd,d->nj", span_emb, params["wu"][0]) + params["bu"][0, 0]
    score = score + (1.0 - maskf) * (-10000.0)
    prob = jax.nn.softmax(score, axis=-1)
    pooled = jnp.sum(prob[..., None] * span_emb, axis=1)
    h = jnp.tanh(pooled @ params["wd"].T + params["bd"][0])
    logits = h @ params["wc"].T + params["bc"][0]
    return logits.reshape(N, M, 5)


if __name__ == "__main__":
    N, L, D, M = 2, 16, 32, 3
    std = 0.02  # config.initializer_range

    key = jax.random.PRNGKey(0)
    ks = jax.random.split(key, 6)
    params = {
        "wu": jax.random.normal(ks[0], (1, D), jnp.float32) * std,   # unary_affine.weight [1, D]
        "bu": jnp.zeros((1, 1), jnp.float32),                        # unary_affine.bias
        "wd": jax.random.normal(ks[1], (D, D), jnp.float32) * std,   # dense.weight [D, D]
        "bd": jnp.zeros((1, D), jnp.float32),                        # dense.bias
        "wc": jax.random.normal(ks[2], (5, D), jnp.float32) * std,   # classifier.weight [5, D]
        "bc": jnp.zeros((1, 5), jnp.float32),                        # classifier.bias
        # binary_affine (used only by train / extract_inference modes)
        "wb": jax.random.normal(ks[3], (2, D), jnp.float32) * std,
        "bb": jnp.zeros((1, 2), jnp.float32),
    }

    sequence_input = jax.random.normal(ks[4], (N, L, D), jnp.float32)

    lens = np.array([12, 9], dtype=np.int32)
    attention_mask = (np.arange(L)[None, :] < lens[:, None]).astype(np.int32)   # [N, L]
    span_starts = np.array([[0, 3, 7], [1, 2, 5]], dtype=np.int32)              # [N, M]
    span_ends = np.array([[2, 3, 11], [4, 2, 8]], dtype=np.int32)               # [N, M]

    out = classify_inference(params, attention_mask, span_starts, span_ends, sequence_input)
    jax.block_until_ready(out)

    ref = classify_inference_ref(params, attention_mask, span_starts, span_ends, sequence_input)
    assert out.shape == (N, M, 5)
    # Tolerance allows for MXU f32-pass precision differing between the Pallas pooling/head
    # matmuls and the XLA reference matmuls.
    np.testing.assert_allclose(np.asarray(out), np.asarray(ref), atol=5e-4, rtol=5e-4)

    print("KERNEL_OK")
</pallas_src>

<mosaic_0001>
module attributes {stable_mosaic.version = 11 : i64} {
  func.func @_token_score_kernel(%arg0: memref<32x32xf32, #tpu.memory_space<vmem>>, %arg1: memref<32x1xf32, #tpu.memory_space<vmem>>, %arg2: memref<1x1xf32, #tpu.memory_space<vmem>>, %arg3: memref<32x1xf32, #tpu.memory_space<vmem>>) attributes {dimension_semantics = [], scalar_prefetch = 0 : i64, scratch_operands = 0 : i64, tpu.core_type = #tpu.core_type<tc>} {
    %c0 = arith.constant 0 : index
    %c0_0 = arith.constant 0 : index
    %0 = vector.load %arg0[%c0, %c0_0] : memref<32x32xf32, #tpu.memory_space<vmem>>, vector<32x32xf32>
    %c0_1 = arith.constant 0 : index
    %c0_2 = arith.constant 0 : index
    %1 = vector.load %arg1[%c0_1, %c0_2] : memref<32x1xf32, #tpu.memory_space<vmem>>, vector<32x1xf32>
    %cst = arith.constant dense<0.000000e+00> : vector<32x1xf32>
    %2 = tpu.matmul %0, %1, %cst {dimension_numbers = #tpu.dot_dimension_numbers<[1], [0], [0], [1], [0, 0, 1, 1], [], []>} : vector<32x32xf32>, vector<32x1xf32>, vector<32x1xf32> -> vector<32x1xf32>
    %c0_3 = arith.constant 0 : index
    %c0_4 = arith.constant 0 : index
    %3 = vector.load %arg2[%c0_3, %c0_4] : memref<1x1xf32, #tpu.memory_space<vmem>>, vector<1x1xf32>
    %4 = vector.broadcast %3 : vector<1x1xf32> to vector<32x1xf32>
    %5 = arith.addf %2, %4 : vector<32x1xf32>
    %c0_5 = arith.constant 0 : index
    %c0_6 = arith.constant 0 : index
    %6 = vector.load %arg3[%c0_5, %c0_6] : memref<32x1xf32, #tpu.memory_space<vmem>>, vector<32x1xf32>
    tpu.vector_store %arg3[%c0_5, %c0_6], %5 {strides = array<i32>} : memref<32x1xf32, #tpu.memory_space<vmem>>, vector<32x1xf32>,
    return
  }
}

</mosaic_0001>

<bundles_post_ra>
// kernel: tpu_custom_call.1
= control target key start
LH: loop header
LB: loop body
LE: loop exit
PB: predicated region body
PF: predicated region fallthrough
CT: control target
= control target key end

     0   :  { %vm31_vm0 = vcmask 261120   ;;  %vm129_vm1 = vcmask 7168   ;;  %s240_s1 = inlined_call_operand.vmem [shape: f32[32,1], index: 1, kind: input, shape index: {}]   ;;  %s241_s0 = inlined_call_operand.vmem [shape: f32[32,32], index: 0, kind: input, shape index: {}]   ;;  %s242_s2 = inlined_call_operand.<no memory space> [shape: f32[1,1], index: 2, kind: input, shape index: {}]   ;;  %s243_s3 = inlined_call_operand.vmem [shape: f32[32,1], index: 3, kind: output, shape index: {}]  }
   0x1   :  { %v20_v0 = vld [vmem:[%s240_s1] sm:$0xff]  ;;  %v21_v1 = vld [vmem:[%s240_s1 + $0x8] sm:$0xff]  ;;  %v22_v2 = vld [vmem:[%s240_s1 + $0x10] sm:$0xff]  ;;  %v8_v3 = vstv %s242_s2 }
   0x2   :  { %v165_v4 = vpack.c.bf16 %v21_v1, %v20_v0  ;;  %v23_v5 = vld [vmem:[%s240_s1 + $0x18] sm:$0xff]  ;;  %v16_v6 = vld [vmem:[%s241_s0] sm:$0xff]  ;;  %v18_v7 = vld [vmem:[%s241_s0 + $0x10] sm:$0xff]  ;;  %9 = vst [vmem:[#allocation2] sm:$0x1] %v8_v3 }
   0x3   :  { %v169_v8 = vpack.c.bf16 %v23_v5, %v22_v2  ;;  %159 = vmatprep.mubr.msk.f32.mxu0 %vm31_vm0, %v16_v6  ;;  %162 = vmatprep.mubr.msk.f32.mxu1 %vm31_vm0, %v18_v7  ;;  %v17_v9 = vld [vmem:[%s241_s0 + $0x8] sm:$0xff]  ;;  %v19_v10 = vld [vmem:[%s241_s0 + $0x18] sm:$0xff] }
   0x4   :  { %166 = vmatprep.subr.bf16.mxu0 %v165_v4  ;;  %173 = vmatprep.subr.bf16.mxu1 %v165_v4 }
   0x5   :  { %168 = vmatpush3.bf16.msra.mxu0 %v165_v4  ;;  %175 = vmatpush3.bf16.msra.mxu1 %v165_v4 }
   0x6   :  { %170 = vmatprep.subr.bf16.mxu0 %v169_v8  ;;  %174 = vmatprep.subr.bf16.mxu1 %v169_v8 }
   0x9   :  { %172 = vmatpush3.bf16.msra.mxu0 %v169_v8  ;;  %176 = vmatpush3.bf16.msra.mxu1 %v169_v8  ;;  %v138_v11 = vld [vmem:[#allocation2] ss:$0 sm:$0xff] }
   0xc   :  { %160 = vmatmul.mubr.msk.f32.vlgmr.msra.gmra.mrb[0].mxu0 %vm31_vm0, %v17_v9  ;;  %163 = vmatmul.mubr.msk.f32.vlgmr.msra.gmra.mrb[0].mxu1 %vm31_vm0, %v19_v10 }
  0xdf   :  { %v161_v12 = vpop.f32.mrb[0].mxu0  ;;  %v164_v13 = vpop.f32.mrb[0].mxu1 }
  0xe0   :  { %v116_v14 = vadd.f32 %v161_v12, %v138_v11  ;;  %v126_v15 = vadd.f32 %v164_v13, %v138_v11  ;;  %v110_v16 = vpop.f32.mrb[1].mxu0  ;;  %v120_v17 = vpop.f32.mrb[1].mxu1 }
  0xe1   :  { %v111_v18 = vadd.f32 %v138_v11, %v110_v16  ;;  %v121_v19 = vadd.f32 %v138_v11, %v120_v17 }
  0xe2   :  { %131 = vst.msk [vmem:[%s243_s3 + $0x8] sm:$0xff] %vm129_vm1, %v116_v14  ;;  %133 = vst.msk [vmem:[%s243_s3 + $0x18] sm:$0xff] %vm129_vm1, %v126_v15 }
  0xe3   :  { %130 = vst.msk [vmem:[%s243_s3] sm:$0xff] %vm129_vm1, %v111_v18  ;;  %132 = vst.msk [vmem:[%s243_s3 + $0x10] sm:$0xff] %vm129_vm1, %v121_v19 }

</bundles_post_ra>
